<compile_context>
chip_gen: v6e
topology: v6e:2x2x1
jax: 0.10.0
libtpu: 0.0.40
codegen_flags: <defaults>
</compile_context>

<pallas_src>
import jax
import jax.numpy as jnp
from jax.experimental import pallas as pl
from jax.experimental.pallas import tpu as pltpu


def _round_up(x, m):
    return (x + m - 1) // m * m


def _pick_tiles(L, B, Hp, in_itemsize, use_bf16):
    """Choose (batch_tile, l_tile, vmem_capacity) from the per-core VMEM budget."""
    try:
        info = pltpu.get_tpu_info()
        vmem_cap = int(getattr(info, "vmem_capacity_bytes", 64 << 20))
    except Exception:
        vmem_cap = 64 << 20                      # conservative (v7x per-TC)
    budget = int(vmem_cap * 0.55)                # headroom for compiler scratch/spills

    gran = 16 if use_bf16 else 8                 # sublane / bf16-packing granularity
    tb = min(256, _round_up(B, gran))            # MXU-friendly target
    if B > gran:                                 # keep >=2 batch steps (v7x: 2 TCs)
        tb = min(tb, _round_up(-(-B // 2), gran))
    tb = max(gran, tb // gran * gran)

    def fixed_bytes(t):
        weights = 2 * 2 * Hp * Hp * in_itemsize            # W_h + W_e, double-buffered
        small = 2 * t * Hp * (in_itemsize + 4)              # hidden + out blocks (dbuf)
        scratch = 2 * t * Hp * 4 + 2 * t * t * 4            # hb + acc + diag temporaries
        return weights + small + scratch + (2 << 20)

    def per_l_bytes(t):
        # enc block (double-buffered) + f32 enc_proj / energy temporaries per L row
        return 2 * t * Hp * (in_itemsize + 4)

    while True:
        avail = budget - fixed_bytes(tb)
        lt = avail // per_l_bytes(tb) if avail > 0 else 0
        if lt >= 1 or tb <= gran:
            break
        tb = max(gran, (tb // 2) // gran * gran)

    lt = int(max(1, min(L, lt)))
    if lt < L and lt > 8:
        lt = lt // 8 * 8
    return tb, lt, vmem_cap


def _make_attn_kernel(L, B, approx_recip, mask_b, mask_l):
    """Build the kernel body (static shape/mask config captured by closure)."""
    NEG_BIG = -1e30

    def _row_scale(mat, scale_row):
        # out[r, c] = scale_row[0, r] * mat[r, c], computed as diag(scale) @ mat on the
        # MXU so the (1, R) lane-vector never needs a lane->sublane relayout.
        R = mat.shape[0]
        r = jax.lax.broadcasted_iota(jnp.int32, (R, R), 0)
        c = jax.lax.broadcasted_iota(jnp.int32, (R, R), 1)
        diag = jnp.where(r == c, jnp.broadcast_to(scale_row, (R, R)), 0.0)
        return jnp.dot(diag, mat, preferred_element_type=jnp.float32)

    def kernel(h_ref, enc_ref, wh_ref, we_ref, b_ref, v_ref, out_ref,
               hb_sc, m_sc, l_sc, acc_sc):
        Lt, TB, Hp = enc_ref.shape
        bi = pl.program_id(0)
        li = pl.program_id(1)
        nl = pl.num_programs(1)

        @pl.when(li == 0)
        def _():
            m_sc[...] = jnp.full_like(m_sc, -jnp.inf)
            l_sc[...] = jnp.zeros_like(l_sc)
            acc_sc[...] = jnp.zeros_like(acc_sc)
            # hidden projection + bias: once per batch tile, reused across L chunks
            hb_sc[...] = (jnp.dot(h_ref[...], wh_ref[...],
                                  preferred_element_type=jnp.float32) + b_ref[...])

        enc = enc_ref[...]                                           # (Lt, TB, Hp)
        if mask_l:
            # zero out-of-range sequence rows so garbage never reaches the context sum
            lpos = li * Lt + jax.lax.broadcasted_iota(jnp.int32, (Lt, TB, 1), 0)
            enc = jnp.where(lpos < L, enc, jnp.zeros_like(enc))

        enc_proj = jnp.dot(enc.reshape(Lt * TB, Hp), we_ref[...],
                           preferred_element_type=jnp.float32).reshape(Lt, TB, Hp)
        energy = jnp.tanh(enc_proj + hb_sc[...])                     # (Lt, TB, Hp) f32
        scores = jnp.sum(energy * v_ref[...], axis=-1)               # (Lt, TB) lane-dense

        if mask_l:
            lpos2 = li * Lt + jax.lax.broadcasted_iota(jnp.int32, (Lt, TB), 0)
            scores = jnp.where(lpos2 < L, scores, NEG_BIG)
        if mask_b:
            # partial batch edge block: keep garbage columns finite (their output
            # rows are dropped by the masked OOB write anyway)
            bpos = bi * TB + jax.lax.broadcasted_iota(jnp.int32, (Lt, TB), 1)
            scores = jnp.where(bpos < B, scores, 0.0)

        # online softmax over the sequence axis (lane-dense layout)
        m_prev = m_sc[...]                                           # (1, TB)
        m_new = jnp.maximum(m_prev, jnp.max(scores, axis=0, keepdims=True))
        alpha = jnp.exp(m_prev - m_new)                              # (1, TB)
        p = jnp.exp(scores - m_new)                                  # (Lt, TB)
        l_sc[...] = alpha * l_sc[...] + jnp.sum(p, axis=0, keepdims=True)
        m_sc[...] = m_new

        ctx = jnp.sum(p[:, :, None] * enc.astype(jnp.float32), axis=0)   # (TB, Hp)
        if mask_b:
            brow = bi * TB + jax.lax.broadcasted_iota(jnp.int32, (TB, Hp), 0)
            ctx = jnp.where(brow < B, ctx, 0.0)
        acc_sc[...] = _row_scale(acc_sc[...], alpha) + ctx

        @pl.when(li == nl - 1)
        def _():
            inv_l = pl.reciprocal(l_sc[...], approx=approx_recip)    # (1, TB)
            out_ref[...] = _row_scale(acc_sc[...], inv_l).astype(out_ref.dtype)

    return kernel


def attn_forward(hidden, encoder_outputs, w, b, v, *, batch_tile=None,
                 lseq_tile=None, use_bf16=True):
    """hidden: (B, H); encoder_outputs: (L, B, H); returns (1, B, H)."""
    L, B, H = encoder_outputs.shape
    assert hidden.shape == (B, H)
    out_dtype = hidden.dtype

    # Split the Linear(2H -> H) weight into hidden / encoder halves, pre-transposed.
    wh = jnp.transpose(w[:, :H])      # (H, H)
    we = jnp.transpose(w[:, H:])      # (H, H)

    # Lane-pad H to a multiple of 128 (only when needed, e.g. H=32): padded lanes are
    # exact zeros and contribute nothing to scores or context; output is sliced back.
    Hp = _round_up(H, 128)
    if Hp != H:
        hidden = jnp.pad(hidden, ((0, 0), (0, Hp - H)))
        encoder_outputs = jnp.pad(encoder_outputs, ((0, 0), (0, 0), (0, Hp - H)))
        wh = jnp.pad(wh, ((0, Hp - H), (0, Hp - H)))
        we = jnp.pad(we, ((0, Hp - H), (0, Hp - H)))
        b = jnp.pad(b, (0, Hp - H))
        v = jnp.pad(v, (0, Hp - H))
    b2 = b.reshape(1, Hp).astype(jnp.float32)
    v2 = v.reshape(1, Hp).astype(jnp.float32)

    if use_bf16:
        h_in = hidden.astype(jnp.bfloat16)
        enc_in = encoder_outputs.astype(jnp.bfloat16)
        wh = wh.astype(jnp.bfloat16)
        we = we.astype(jnp.bfloat16)
    else:
        h_in = hidden
        enc_in = encoder_outputs
    in_itemsize = jnp.dtype(enc_in.dtype).itemsize

    TB, Lt, vmem_cap = _pick_tiles(L, B, Hp, in_itemsize, use_bf16)
    if batch_tile is not None:
        TB = batch_tile
    if lseq_tile is not None:
        Lt = lseq_tile
    nb = -(-B // TB)
    nl = -(-L // Lt)
    mask_b = (B % TB) != 0           # no wrapper-side batch pad: mask the edge block
    mask_l = (L % Lt) != 0

    kernel = _make_attn_kernel(L, B, approx_recip=use_bf16,
                               mask_b=mask_b, mask_l=mask_l)

    out = pl.pallas_call(
        kernel,
        out_shape=jax.ShapeDtypeStruct((B, Hp), out_dtype),
        grid_spec=pltpu.PrefetchScalarGridSpec(
            num_scalar_prefetch=0,
            grid=(nb, nl),
            in_specs=[
                pl.BlockSpec((TB, Hp), lambda i, l: (i, 0)),          # hidden tile
                pl.BlockSpec((Lt, TB, Hp), lambda i, l: (l, i, 0)),   # enc chunk (native layout)
                pl.BlockSpec((Hp, Hp), lambda i, l: (0, 0)),          # W_h (resident)
                pl.BlockSpec((Hp, Hp), lambda i, l: (0, 0)),          # W_e (resident)
                pl.BlockSpec((1, Hp), lambda i, l: (0, 0)),           # bias (f32)
                pl.BlockSpec((1, Hp), lambda i, l: (0, 0)),           # v    (f32)
            ],
            out_specs=pl.BlockSpec((TB, Hp), lambda i, l: (i, 0)),
            scratch_shapes=[
                pltpu.VMEM((TB, Hp), jnp.float32),   # hb: hidden proj + bias
                pltpu.VMEM((1, TB), jnp.float32),    # m: running max
                pltpu.VMEM((1, TB), jnp.float32),    # l: running denom
                pltpu.VMEM((TB, Hp), jnp.float32),   # acc: running context
            ],
        ),
        compiler_params=pltpu.CompilerParams(
            dimension_semantics=("parallel", "arbitrary"),
            vmem_limit_bytes=int(vmem_cap * 0.9),
        ),
    )(h_in, enc_in, wh, we, b2, v2)

    context = out[:, :H]               # drop lane padding
    return context[None, :, :]         # (1, B, H) — PyTorch return layout


def attn_reference(hidden, encoder_outputs, w, b, v):
    """Pure-JAX reference mirroring the PyTorch forward, for sanity checking."""
    enc = jnp.transpose(encoder_outputs, (1, 0, 2))          # (B, L, H)
    B, L, H = enc.shape
    H_rep = jnp.broadcast_to(hidden[:, None, :], (B, L, H))
    cat = jnp.concatenate([H_rep, enc], axis=2)              # (B, L, 2H)
    energy = jnp.tanh(cat @ w.T + b)                         # (B, L, H)
    scores = jnp.einsum("h,blh->bl", v, energy)[:, None, :]  # (B, 1, L)
    p = jax.nn.softmax(scores, axis=2)
    ctx = jnp.einsum("bol,blh->boh", p, enc)                 # (B, 1, H)
    return jnp.transpose(ctx, (1, 0, 2))                     # (1, B, H)


if __name__ == "__main__":
    B, L, H = 2, 8, 32

    key = jax.random.PRNGKey(0)
    k1, k2, k3, k4, k5 = jax.random.split(key, 5)

    hidden = jax.random.normal(k1, (B, H), dtype=jnp.float32)
    encoder_outputs = jax.random.normal(k2, (L, B, H), dtype=jnp.float32)

    bound = 1.0 / (2.0 * H) ** 0.5
    w = jax.random.uniform(k3, (H, 2 * H), jnp.float32, -bound, bound)      # attn.weight
    bb = jax.random.uniform(k4, (H,), jnp.float32, -bound, bound)           # attn.bias
    v = (1.0 / H ** 0.5) * jax.random.normal(k5, (H,), dtype=jnp.float32)   # self.v

    ref = attn_reference(hidden, encoder_outputs, w, bb, v)

    # 1) f32 path (single L chunk; partial batch edge block since B=2 < TB).
    out_f32 = attn_forward(hidden, encoder_outputs, w, bb, v, use_bf16=False)
    jax.block_until_ready(out_f32)
    assert out_f32.shape == (1, B, H), out_f32.shape
    assert jnp.allclose(out_f32, ref, rtol=1e-5, atol=1e-5), "f32 mismatch vs reference"

    # 2) forced L tiling (online softmax across ragged L chunks), still f32-exact.
    out_lt = attn_forward(hidden, encoder_outputs, w, bb, v,
                          use_bf16=False, lseq_tile=3)
    jax.block_until_ready(out_lt)
    assert jnp.allclose(out_lt, ref, rtol=1e-5, atol=1e-5), "L-tiled mismatch vs reference"

    # 3) default path: bf16 inputs/weights, f32 accumulation (looser tolerance).
    out_bf16 = attn_forward(hidden, encoder_outputs, w, bb, v)
    jax.block_until_ready(out_bf16)
    assert out_bf16.shape == (1, B, H), out_bf16.shape
    assert jnp.allclose(out_bf16, ref, rtol=1e-1, atol=1e-1), "bf16 mismatch vs reference"

    print("KERNEL_OK")
</pallas_src>

<mosaic_0001>
module attributes {stable_mosaic.version = 11 : i64} {
  func.func @kernel(%arg0: i32, %arg1: i32, %arg2: memref<8x128xf32, #tpu.memory_space<vmem>>, %arg3: memref<8x8x128xf32, #tpu.memory_space<vmem>>, %arg4: memref<128x128xf32, #tpu.memory_space<vmem>>, %arg5: memref<128x128xf32, #tpu.memory_space<vmem>>, %arg6: memref<1x128xf32, #tpu.memory_space<vmem>>, %arg7: memref<1x128xf32, #tpu.memory_space<vmem>>, %arg8: memref<8x128xf32, #tpu.memory_space<vmem>>, %arg9: memref<8x128xf32, #tpu.memory_space<vmem>>, %arg10: memref<1x8xf32, #tpu.memory_space<vmem>>, %arg11: memref<1x8xf32, #tpu.memory_space<vmem>>, %arg12: memref<8x128xf32, #tpu.memory_space<vmem>>) attributes {dimension_semantics = [#tpu.dimension_semantics<parallel>, #tpu.dimension_semantics<arbitrary>], iteration_bounds = array<i64: 1, 1>, scalar_prefetch = 0 : i64, scratch_operands = 4 : i64, tpu.core_type = #tpu.core_type<tc>, window_params = [{transform_indices = @transform_0, window_bounds = array<i64: 8, 128>}, {transform_indices = @transform_1, window_bounds = array<i64: 8, 8, 128>}, {pipeline_mode = #tpu.pipeline_mode<synchronous>, transform_indices = @transform_2, window_bounds = array<i64: 128, 128>}, {pipeline_mode = #tpu.pipeline_mode<synchronous>, transform_indices = @transform_3, window_bounds = array<i64: 128, 128>}, {pipeline_mode = #tpu.pipeline_mode<synchronous>, transform_indices = @transform_4, window_bounds = array<i64: 1, 128>}, {pipeline_mode = #tpu.pipeline_mode<synchronous>, transform_indices = @transform_5, window_bounds = array<i64: 1, 128>}, {transform_indices = @transform_6, window_bounds = array<i64: 8, 128>}]} {
    %c0_i32 = arith.constant 0 : i32
    %0 = arith.cmpi eq, %arg1, %c0_i32 : i32
    %1 = arith.extui %0 : i1 to i32
    %c0_i32_0 = arith.constant 0 : i32
    %2 = arith.cmpi ne, %1, %c0_i32_0 : i32
    scf.if %2 {
      %cst_33 = arith.constant 0xFF800000 : f32
      %68 = vector.broadcast %cst_33 : f32 to vector<1x8xf32>
      %c0_34 = arith.constant 0 : index
      %c0_35 = arith.constant 0 : index
      %69 = vector.load %arg10[%c0_34, %c0_35] : memref<1x8xf32, #tpu.memory_space<vmem>>, vector<1x8xf32>
      tpu.vector_store %arg10[%c0_34, %c0_35], %68 {strides = array<i32>} : memref<1x8xf32, #tpu.memory_space<vmem>>, vector<1x8xf32>,
      %cst_36 = arith.constant 0.000000e+00 : f32
      %70 = vector.broadcast %cst_36 : f32 to vector<1x8xf32>
      %c0_37 = arith.constant 0 : index
      %c0_38 = arith.constant 0 : index
      %71 = vector.load %arg11[%c0_37, %c0_38] : memref<1x8xf32, #tpu.memory_space<vmem>>, vector<1x8xf32>
      tpu.vector_store %arg11[%c0_37, %c0_38], %70 {strides = array<i32>} : memref<1x8xf32, #tpu.memory_space<vmem>>, vector<1x8xf32>,
      %cst_39 = arith.constant 0.000000e+00 : f32
      %72 = vector.broadcast %cst_39 : f32 to vector<8x128xf32>
      %c0_40 = arith.constant 0 : index
      %c0_41 = arith.constant 0 : index
      %73 = vector.load %arg12[%c0_40, %c0_41] : memref<8x128xf32, #tpu.memory_space<vmem>>, vector<8x128xf32>
      tpu.vector_store %arg12[%c0_40, %c0_41], %72 {strides = array<i32>} : memref<8x128xf32, #tpu.memory_space<vmem>>, vector<8x128xf32>,
      %c0_42 = arith.constant 0 : index
      %c0_43 = arith.constant 0 : index
      %74 = vector.load %arg2[%c0_42, %c0_43] : memref<8x128xf32, #tpu.memory_space<vmem>>, vector<8x128xf32>
      %c0_44 = arith.constant 0 : index
      %c0_45 = arith.constant 0 : index
      %75 = vector.load %arg4[%c0_44, %c0_45] : memref<128x128xf32, #tpu.memory_space<vmem>>, vector<128x128xf32>
      %cst_46 = arith.constant dense<0.000000e+00> : vector<8x128xf32>
      %76 = tpu.matmul %74, %75, %cst_46 {dimension_numbers = #tpu.dot_dimension_numbers<[1], [0], [0], [1], [0, 0, 1, 1], [], []>} : vector<8x128xf32>, vector<128x128xf32>, vector<8x128xf32> -> vector<8x128xf32>
      %c0_47 = arith.constant 0 : index
      %c0_48 = arith.constant 0 : index
      %77 = vector.load %arg6[%c0_47, %c0_48] : memref<1x128xf32, #tpu.memory_space<vmem>>, vector<1x128xf32>
      %78 = vector.broadcast %77 : vector<1x128xf32> to vector<8x128xf32>
      %79 = arith.addf %76, %78 : vector<8x128xf32>
      %c0_49 = arith.constant 0 : index
      %c0_50 = arith.constant 0 : index
      %80 = vector.load %arg9[%c0_49, %c0_50] : memref<8x128xf32, #tpu.memory_space<vmem>>, vector<8x128xf32>
      tpu.vector_store %arg9[%c0_49, %c0_50], %79 {strides = array<i32>} : memref<8x128xf32, #tpu.memory_space<vmem>>, vector<8x128xf32>,
    } else {
    }
    %c0 = arith.constant 0 : index
    %c0_1 = arith.constant 0 : index
    %c0_2 = arith.constant 0 : index
    %3 = vector.load %arg3[%c0, %c0_1, %c0_2] : memref<8x8x128xf32, #tpu.memory_space<vmem>>, vector<8x8x128xf32>
    %4 = vector.shape_cast %3 : vector<8x8x128xf32> to vector<64x128xf32>
    %c0_3 = arith.constant 0 : index
    %c0_4 = arith.constant 0 : index
    %5 = vector.load %arg5[%c0_3, %c0_4] : memref<128x128xf32, #tpu.memory_space<vmem>>, vector<128x128xf32>
    %cst = arith.constant dense<0.000000e+00> : vector<64x128xf32>
    %6 = tpu.matmul %4, %5, %cst {dimension_numbers = #tpu.dot_dimension_numbers<[1], [0], [0], [1], [0, 0, 1, 1], [], []>} : vector<64x128xf32>, vector<128x128xf32>, vector<64x128xf32> -> vector<64x128xf32>
    %7 = vector.shape_cast %6 : vector<64x128xf32> to vector<8x8x128xf32>
    %c0_5 = arith.constant 0 : index
    %c0_6 = arith.constant 0 : index
    %8 = vector.load %arg9[%c0_5, %c0_6] : memref<8x128xf32, #tpu.memory_space<vmem>>, vector<8x128xf32>
    %9 = vector.shape_cast %8 : vector<8x128xf32> to vector<1x8x128xf32>
    %10 = vector.broadcast %9 : vector<1x8x128xf32> to vector<8x8x128xf32>
    %11 = arith.addf %7, %10 : vector<8x8x128xf32>
    %12 = math.tanh %11 : vector<8x8x128xf32>
    %c0_7 = arith.constant 0 : index
    %c0_8 = arith.constant 0 : index
    %13 = vector.load %arg7[%c0_7, %c0_8] : memref<1x128xf32, #tpu.memory_space<vmem>>, vector<1x128xf32>
    %14 = vector.shape_cast %13 : vector<1x128xf32> to vector<1x1x128xf32>
    %15 = vector.broadcast %14 : vector<1x1x128xf32> to vector<8x8x128xf32>
    %16 = arith.mulf %12, %15 : vector<8x8x128xf32>
    %cst_9 = arith.constant dense<0.000000e+00> : vector<8x8xf32>
    %17 = vector.multi_reduction <add>, %16, %cst_9 [2] : vector<8x8x128xf32> to vector<8x8xf32>
    %c8_i32 = arith.constant 8 : i32
    %18 = arith.muli %arg0, %c8_i32 : i32
    %19 = tpu.iota {dimensions = array<i32: 1>} : vector<8x8xi32>
    %20 = vector.broadcast %18 : i32 to vector<8x8xi32>
    %21 = arith.addi %20, %19 : vector<8x8xi32>
    %c2_i32 = arith.constant 2 : i32
    %22 = vector.broadcast %c2_i32 : i32 to vector<8x8xi32>
    %23 = arith.cmpi slt, %21, %22 : vector<8x8xi32>
    %cst_10 = arith.constant 0.000000e+00 : f32
    %24 = vector.broadcast %cst_10 : f32 to vector<8x8xf32>
    %25 = arith.select %23, %17, %24 : vector<8x8xi1>, vector<8x8xf32>
    %c0_11 = arith.constant 0 : index
    %c0_12 = arith.constant 0 : index
    %26 = vector.load %arg10[%c0_11, %c0_12] : memref<1x8xf32, #tpu.memory_space<vmem>>, vector<1x8xf32>
    %cst_13 = arith.constant dense<0xFF800000> : vector<8xf32>
    %27 = vector.multi_reduction <maximumf>, %25, %cst_13 [0] : vector<8x8xf32> to vector<8xf32>
    %28 = vector.shape_cast %27 : vector<8xf32> to vector<1x8xf32>
    %29 = arith.maximumf %26, %28 : vector<1x8xf32>
    %30 = arith.subf %26, %29 : vector<1x8xf32>
    %31 = math.exp %30 : vector<1x8xf32>
    %32 = vector.broadcast %29 : vector<1x8xf32> to vector<8x8xf32>
    %33 = arith.subf %25, %32 : vector<8x8xf32>
    %34 = math.exp %33 : vector<8x8xf32>
    %c0_14 = arith.constant 0 : index
    %c0_15 = arith.constant 0 : index
    %35 = vector.load %arg11[%c0_14, %c0_15] : memref<1x8xf32, #tpu.memory_space<vmem>>, vector<1x8xf32>
    %36 = arith.mulf %31, %35 : vector<1x8xf32>
    %cst_16 = arith.constant dense<0.000000e+00> : vector<8xf32>
    %37 = vector.multi_reduction <add>, %34, %cst_16 [0] : vector<8x8xf32> to vector<8xf32>
    %38 = vector.shape_cast %37 : vector<8xf32> to vector<1x8xf32>
    %39 = arith.addf %36, %38 : vector<1x8xf32>
    %c0_17 = arith.constant 0 : index
    %c0_18 = arith.constant 0 : index
    %40 = vector.load %arg11[%c0_17, %c0_18] : memref<1x8xf32, #tpu.memory_space<vmem>>, vector<1x8xf32>
    tpu.vector_store %arg11[%c0_17, %c0_18], %39 {strides = array<i32>} : memref<1x8xf32, #tpu.memory_space<vmem>>, vector<1x8xf32>,
    %c0_19 = arith.constant 0 : index
    %c0_20 = arith.constant 0 : index
    %41 = vector.load %arg10[%c0_19, %c0_20] : memref<1x8xf32, #tpu.memory_space<vmem>>, vector<1x8xf32>
    tpu.vector_store %arg10[%c0_19, %c0_20], %29 {strides = array<i32>} : memref<1x8xf32, #tpu.memory_space<vmem>>, vector<1x8xf32>,
    %42 = vector.shape_cast %34 : vector<8x8xf32> to vector<8x8x1xf32>
    %43 = vector.broadcast %42 : vector<8x8x1xf32> to vector<8x8x128xf32>
    %44 = arith.mulf %43, %3 : vector<8x8x128xf32>
    %cst_21 = arith.constant dense<0.000000e+00> : vector<8x128xf32>
    %45 = vector.multi_reduction <add>, %44, %cst_21 [0] : vector<8x8x128xf32> to vector<8x128xf32>
    %c8_i32_22 = arith.constant 8 : i32
    %46 = arith.muli %arg0, %c8_i32_22 : i32
    %47 = tpu.iota {dimensions = array<i32: 0>} : vector<8x128xi32>
    %48 = vector.broadcast %46 : i32 to vector<8x128xi32>
    %49 = arith.addi %48, %47 : vector<8x128xi32>
    %c2_i32_23 = arith.constant 2 : i32
    %50 = vector.broadcast %c2_i32_23 : i32 to vector<8x128xi32>
    %51 = arith.cmpi slt, %49, %50 : vector<8x128xi32>
    %cst_24 = arith.constant 0.000000e+00 : f32
    %52 = vector.broadcast %cst_24 : f32 to vector<8x128xf32>
    %53 = arith.select %51, %45, %52 : vector<8x128xi1>, vector<8x128xf32>
    %c0_25 = arith.constant 0 : index
    %c0_26 = arith.constant 0 : index
    %54 = vector.load %arg12[%c0_25, %c0_26] : memref<8x128xf32, #tpu.memory_space<vmem>>, vector<8x128xf32>
    %55 = tpu.iota {dimensions = array<i32: 0>} : vector<8x8xi32>
    %56 = tpu.iota {dimensions = array<i32: 1>} : vector<8x8xi32>
    %57 = arith.cmpi eq, %55, %56 : vector<8x8xi32>
    %58 = vector.shape_cast %31 : vector<1x8xf32> to vector<1x8xf32>
    %59 = vector.broadcast %58 : vector<1x8xf32> to vector<8x8xf32>
    %cst_27 = arith.constant 0.000000e+00 : f32
    %60 = vector.broadcast %cst_27 : f32 to vector<8x8xf32>
    %61 = arith.select %57, %59, %60 : vector<8x8xi1>, vector<8x8xf32>
    %cst_28 = arith.constant dense<0.000000e+00> : vector<8x128xf32>
    %62 = tpu.matmul %61, %54, %cst_28 {dimension_numbers = #tpu.dot_dimension_numbers<[1], [0], [0], [1], [0, 0, 1, 1], [], []>} : vector<8x8xf32>, vector<8x128xf32>, vector<8x128xf32> -> vector<8x128xf32>
    %63 = arith.addf %62, %53 : vector<8x128xf32>
    %c0_29 = arith.constant 0 : index
    %c0_30 = arith.constant 0 : index
    %64 = vector.load %arg12[%c0_29, %c0_30] : memref<8x128xf32, #tpu.memory_space<vmem>>, vector<8x128xf32>
    tpu.vector_store %arg12[%c0_29, %c0_30], %63 {strides = array<i32>} : memref<8x128xf32, #tpu.memory_space<vmem>>, vector<8x128xf32>,
    %c0_i32_31 = arith.constant 0 : i32
    %65 = arith.cmpi eq, %arg1, %c0_i32_31 : i32
    %66 = arith.extui %65 : i1 to i32
    %c0_i32_32 = arith.constant 0 : i32
    %67 = arith.cmpi ne, %66, %c0_i32_32 : i32
    scf.if %67 {
      %c0_33 = arith.constant 0 : index
      %c0_34 = arith.constant 0 : index
      %68 = vector.load %arg11[%c0_33, %c0_34] : memref<1x8xf32, #tpu.memory_space<vmem>>, vector<1x8xf32>
      %69 = tpu.reciprocal %68 : vector<1x8xf32> -> vector<1x8xf32>
      %c0_35 = arith.constant 0 : index
      %c0_36 = arith.constant 0 : index
      %70 = vector.load %arg12[%c0_35, %c0_36] : memref<8x128xf32, #tpu.memory_space<vmem>>, vector<8x128xf32>
      %71 = tpu.iota {dimensions = array<i32: 0>} : vector<8x8xi32>
      %72 = tpu.iota {dimensions = array<i32: 1>} : vector<8x8xi32>
      %73 = arith.cmpi eq, %71, %72 : vector<8x8xi32>
      %74 = vector.shape_cast %69 : vector<1x8xf32> to vector<1x8xf32>
      %75 = vector.broadcast %74 : vector<1x8xf32> to vector<8x8xf32>
      %cst_37 = arith.constant 0.000000e+00 : f32
      %76 = vector.broadcast %cst_37 : f32 to vector<8x8xf32>
      %77 = arith.select %73, %75, %76 : vector<8x8xi1>, vector<8x8xf32>
      %cst_38 = arith.constant dense<0.000000e+00> : vector<8x128xf32>
      %78 = tpu.matmul %77, %70, %cst_38 {dimension_numbers = #tpu.dot_dimension_numbers<[1], [0], [0], [1], [0, 0, 1, 1], [], []>} : vector<8x8xf32>, vector<8x128xf32>, vector<8x128xf32> -> vector<8x128xf32>
      %c0_39 = arith.constant 0 : index
      %c0_40 = arith.constant 0 : index
      %79 = vector.load %arg8[%c0_39, %c0_40] : memref<8x128xf32, #tpu.memory_space<vmem>>, vector<8x128xf32>
      tpu.vector_store %arg8[%c0_39, %c0_40], %78 {strides = array<i32>} : memref<8x128xf32, #tpu.memory_space<vmem>>, vector<8x128xf32>,
    } else {
    }
    return
  }
  func.func @transform_0(%arg0: i32, %arg1: i32) -> (i32, i32) {
    %c0_i32 = arith.constant 0 : i32
    %c0_i32_0 = arith.constant 0 : i32
    return %arg0, %c0_i32 : i32, i32
  }
  func.func @transform_1(%arg0: i32, %arg1: i32) -> (i32, i32, i32) {
    %c0_i32 = arith.constant 0 : i32
    %c0_i32_0 = arith.constant 0 : i32
    return %arg1, %arg0, %c0_i32 : i32, i32, i32
  }
  func.func @transform_2(%arg0: i32, %arg1: i32) -> (i32, i32) {
    %c0_i32 = arith.constant 0 : i32
    %c0_i32_0 = arith.constant 0 : i32
    %c0_i32_1 = arith.constant 0 : i32
    return %c0_i32, %c0_i32_0 : i32, i32
  }
  func.func @transform_3(%arg0: i32, %arg1: i32) -> (i32, i32) {
    %c0_i32 = arith.constant 0 : i32
    %c0_i32_0 = arith.constant 0 : i32
    %c0_i32_1 = arith.constant 0 : i32
    return %c0_i32, %c0_i32_0 : i32, i32
  }
  func.func @transform_4(%arg0: i32, %arg1: i32) -> (i32, i32) {
    %c0_i32 = arith.constant 0 : i32
    %c0_i32_0 = arith.constant 0 : i32
    %c0_i32_1 = arith.constant 0 : i32
    return %c0_i32, %c0_i32_0 : i32, i32
  }
  func.func @transform_5(%arg0: i32, %arg1: i32) -> (i32, i32) {
    %c0_i32 = arith.constant 0 : i32
    %c0_i32_0 = arith.constant 0 : i32
    %c0_i32_1 = arith.constant 0 : i32
    return %c0_i32, %c0_i32_0 : i32, i32
  }
  func.func @transform_6(%arg0: i32, %arg1: i32) -> (i32, i32) {
    %c0_i32 = arith.constant 0 : i32
    %c0_i32_0 = arith.constant 0 : i32
    return %arg0, %c0_i32 : i32, i32
  }
}

</mosaic_0001>

<bundles_post_ra>
// kernel: tpu_custom_call.1
= control target key start
LH: loop header
LB: loop body
LE: loop exit
PB: predicated region body
PF: predicated region fallthrough
CT: control target
= control target key end

     0   :  { %11 = vsyncpa [#allocation7], 0  ;;  %s1184_s0 = inlined_call_operand.hbm [shape: f32[2,128], index: 0, kind: input, shape index: {}]   ;;  %s1185_s1 = inlined_call_operand.hbm [shape: f32[8,2,128], index: 1, kind: input, shape index: {}]   ;;  %s1186_s2 = inlined_call_operand.hbm [shape: f32[128,128], index: 2, kind: input, shape index: {}]   ;;  %s1187_s3 = inlined_call_operand.hbm [shape: f32[128,128], index: 3, kind: input, shape index: {}]   ;;  %s1188_s4 = inlined_call_operand.vmem [shape: f32[1,128], index: 4, kind: input, shape index: {}]   ;;  %s1189_s5 = inlined_call_operand.vmem [shape: f32[1,128], index: 5, kind: input, shape index: {}]   ;;  %s1190_s6 = inlined_call_operand.hbm [shape: f32[2,128], index: 6, kind: output, shape index: {}]  }
   0x1   :  { %12 = vsyncpa [#allocation10], 0 }
   0x2   :  { %13 = vsyncpa [#allocation13], 0 }
   0x3   :  { %14 = vsyncpa [#allocation8], 0 }
   0x4   :  { %19 = vsyncadd [#allocation7], 96  ;;  %s1014_s21 = smov [#allocation6]  }
   0x5   :  { %s20_s22 = sshll.u32 %s1014_s21, 4  ;;  %s21_s22 = int_to_ptr.vmem [resolvable:$true] %s20_s22 }
   0x6   :  { %s934_s23 = scalar_lea.vmem %s21_s22, 32  ;;  %s938_s24 = scalar_lea.vmem %s21_s22, 128 }
   0x7   :  { %p935_p0 = scmp.ne.s32.totalorder %s21_s22, %s934_s23  ;;  %p939_p1 = scmp.lt.s32.totalorder %s21_s22, %s21_s22 }
   0x8   :  { %p940_p2 = scmp.lt.s32.totalorder %s938_s24, %s934_s23 }
   0xa   :  { %p941_p3 = por %p940_p2, %p939_p1 }
   0xc   :  { %p942_p4 = pnand %p941_p3, %p935_p0 }
   0xe   :  { %945 = shalt.err (!%p942_p4)
}
   0xf   :  { %s1015_s25 = smov 32   ;;  %s1016_s26 = smov 2  }
  0x10   :  { %26 = dma.hbm_to_vmem [thread:$0]  %s1184_s0, 32, %s21_s22, [#allocation7], %s1015_s25, %s1015_s25, %s1016_s26  }
  0x11   :  { %31 = vsyncadd [#allocation10], 768  ;;  %s36_s29 = sld [smem:[#allocation0]]   ;;  %s1017_s30 = smov [#allocation9]  }
  0x12   :  { %s44_s7 = sshll.u32 %s1017_s30, 4  ;;  %s1018_s8 = smov 32   ;;  %s45_s7 = int_to_ptr.vmem [resolvable:$true] %s44_s7 }
  0x13   :  { %51 = sst [smem:[#allocation16]] %s1018_s8  ;;  %s1019_s9 = smov 128  }
  0x14   :  { %53 = sst [smem:[#allocation16 + $0x1]] %s1019_s9  ;;  %s1020_s10 = smov 1  }
  0x15   :  { %55 = sst [smem:[#allocation16 + $0x2]] %s1020_s10  ;;  %s1021_s13 = smov 2  }
  0x16   :  { %57 = sst [smem:[#allocation16 + $0x3]] %s1018_s8  ;;  %s1022_s14 = smov [#allocation10]  }
  0x17   :  { %s746_s11 = sshll.u32 %s36_s29, 26  ;;  %59 = sst [smem:[#allocation16 + $0x4]] %s1018_s8 }
  0x18   :  { %s747_s12 = sadd.s32 134217728, %s746_s11  ;;  %61 = sst [smem:[#allocation16 + $0x5]] %s1021_s13 }
  0x19   :  { %s1023_s15 = smov 131072   ;;  %s1024_s17 = smov [#allocation11]  }
  0x1a   :  { %63 = dma.general %s1185_s1, 256, %s45_s7, %s1022_s14, %s1023_s15, [#allocation16], %s747_s12, 0  }
  0x1b   :  { %s69_s18 = sshll.u32 %s1024_s17, 4  ;;  %s70_s18 = int_to_ptr.vmem [resolvable:$true] %s69_s18 }
  0x1c   :  { %s954_s19 = scalar_lea.vmem %s70_s18, 2048  ;;  %p959_p6 = scmp.lt.s32.totalorder %s70_s18, %s70_s18 }
  0x1d   :  { %p955_p5 = scmp.ne.s32.totalorder %s70_s18, %s954_s19  ;;  %p960_p7 = scmp.lt.s32.totalorder %s954_s19, %s954_s19 }
  0x1f   :  { %p961_p8 = por %p960_p7, %p959_p6 }
  0x21   :  { %p962_p9 = pnand %p961_p8, %p955_p5 }
  0x23   :  { %965 = shalt.err (!%p962_p9)
}
  0x24   :  { %s1025_s20 = smov 128   ;;  %s1026_s21 = smov 8  }
  0x25   :  { %75 = dma.hbm_to_vmem [thread:$0]  %s1186_s2, 2048, %s70_s18, [#allocation10], %s1025_s20, %s1025_s20, %s1026_s21  }
  0x26   :  { %s1027_s24 = smov [#allocation12]  }
  0x27   :  { %s81_s27 = sshll.u32 %s1027_s24, 4  ;;  %s82_s27 = int_to_ptr.vmem [resolvable:$true] %s81_s27 }
  0x28   :  { %s974_s1 = scalar_lea.vmem %s82_s27, 2048  ;;  %p979_p11 = scmp.lt.s32.totalorder %s82_s27, %s82_s27 }
  0x29   :  { %p975_p10 = scmp.ne.s32.totalorder %s82_s27, %s974_s1  ;;  %p980_p12 = scmp.lt.s32.totalorder %s974_s1, %s974_s1 }
  0x2b   :  { %p981_p13 = por %p980_p12, %p979_p11 }
  0x2d   :  { %p982_p0 = pnand %p981_p13, %p975_p10 }
  0x2f   :  { %985 = shalt.err (!%p982_p0)
}
  0x30   :  { %87 = dma.hbm_to_vmem [thread:$0]  %s1187_s3, 2048, %s82_s27, [#allocation13], %s1025_s20, %s1025_s20, %s1026_s21  }
  0x31   :  { %1006 = dma.done.wait [#allocation7], 128  }
  0x32   :  { %1007 = vsyncadd [#allocation7], 4294967168 }
  0x33   :  { %1008 = dma.done.wait [#allocation10], 3072  }
  0x34   :  { %1009 = vsyncadd [#allocation10], 4294964224 }
  0x35   :  { %1010 = dma.done.wait [#allocation13], 2048  }
  0x36   :  { %1011 = vsyncadd [#allocation13], 4294965248  ;;  %v1028_v0 = vmov 0.0   ;;  %vm1029_vm0 = vmmov 0   ;;  %v128_v1 = vld [vmem:[#allocation11 + $0x78] sm:$0xff]  ;;  %v127_v3 = vld [vmem:[#allocation11 + $0x70] sm:$0xff] }
  0x37   :  { %797 = vmatprep.subr.mxu0 %v1028_v0  ;;  %829 = vmatprep.mubr.msk.f32.mxu0 %vm1029_vm0, %v1028_v0  ;;  %v230_v2 = vld [vmem:[#allocation12 + $0x78] sm:$0xff]  ;;  %v229_v4 = vld [vmem:[#allocation12 + $0x70] sm:$0xff]  ;;  %v126_v5 = vld [vmem:[#allocation11 + $0x68] sm:$0xff]  ;;  %vm108_vm1 = vcmask 57344   ;;  %vm430_vm2 = vcmask 1041409   ;;  %vm432_vm3 = vcmask 1042434  }
  0x38   :  { %798 = vmatpush3.msra.mxu0 %v128_v1  ;;  %832 = vmatprep.subr.mxu1 %v230_v2  ;;  %v228_v6 = vld [vmem:[#allocation12 + $0x68] sm:$0xff]  ;;  %v125_v7 = vld [vmem:[#allocation11 + $0x60] sm:$0xff]  ;;  %v124_v9 = vld [vmem:[#allocation11 + $0x58] sm:$0xff]  ;;  %110 = vst.msk [vmem:[#allocation4] sm:$0x1] %vm108_vm1, %v1028_v0  ;;  %vm434_vm4 = vcmask 1043459  }
  0x39   :  { %799 = vmatprep.subr.mxu0 %v1028_v0  ;;  %833 = vmatpush3.msra.mxu1 %v230_v2  ;;  %v227_v8 = vld [vmem:[#allocation12 + $0x60] sm:$0xff]  ;;  %v226_v10 = vld [vmem:[#allocation12 + $0x58] sm:$0xff]  ;;  %v123_v11 = vld [vmem:[#allocation11 + $0x50] sm:$0xff]  ;;  %vm436_vm5 = vcmask 1044484   ;;  %vm438_vm6 = vcmask 1045509   ;;  %vm440_vm7 = vcmask 1046534  }
  0x3a   :  { %800 = vmatpush3.msra.mxu0 %v127_v3  ;;  %834 = vmatprep.subr.mxu1 %v229_v4  ;;  %v225_v12 = vld [vmem:[#allocation12 + $0x50] sm:$0xff]  ;;  %v122_v13 = vld [vmem:[#allocation11 + $0x48] sm:$0xff]  ;;  %v121_v15 = vld [vmem:[#allocation11 + $0x40] sm:$0xff]  ;;  %vm442_vm8 = vcmask 1047559   ;;  %vm447_vm10 = vcmask 64512  }
  0x3b   :  { %801 = vmatprep.subr.mxu0 %v1028_v0  ;;  %835 = vmatpush3.msra.mxu1 %v229_v4  ;;  %v224_v14 = vld [vmem:[#allocation12 + $0x48] sm:$0xff]  ;;  %v223_v16 = vld [vmem:[#allocation12 + $0x40] sm:$0xff]  ;;  %v120_v17 = vld [vmem:[#allocation11 + $0x38] sm:$0xff] }
  0x3c   :  { %802 = vmatpush3.msra.mxu0 %v126_v5  ;;  %836 = vmatprep.subr.mxu1 %v228_v6  ;;  %v222_v18 = vld [vmem:[#allocation12 + $0x38] sm:$0xff]  ;;  %v119_v19 = vld [vmem:[#allocation11 + $0x30] sm:$0xff]  ;;  %v118_v21 = vld [vmem:[#allocation11 + $0x28] sm:$0xff] }
  0x3d   :  { %803 = vmatprep.subr.mxu0 %v1028_v0  ;;  %837 = vmatpush3.msra.mxu1 %v228_v6  ;;  %v221_v20 = vld [vmem:[#allocation12 + $0x30] sm:$0xff]  ;;  %v220_v22 = vld [vmem:[#allocation12 + $0x28] sm:$0xff]  ;;  %v117_v23 = vld [vmem:[#allocation11 + $0x20] sm:$0xff] }
  0x3e   :  { %804 = vmatpush3.msra.mxu0 %v125_v7  ;;  %838 = vmatprep.subr.mxu1 %v227_v8  ;;  %v219_v24 = vld [vmem:[#allocation12 + $0x20] sm:$0xff]  ;;  %v116_v25 = vld [vmem:[#allocation11 + $0x18] sm:$0xff]  ;;  %v115_v27 = vld [vmem:[#allocation11 + $0x10] sm:$0xff] }
  0x3f   :  { %805 = vmatprep.subr.mxu0 %v1028_v0  ;;  %839 = vmatpush3.msra.mxu1 %v227_v8  ;;  %v218_v26 = vld [vmem:[#allocation12 + $0x18] sm:$0xff]  ;;  %v217_v28 = vld [vmem:[#allocation12 + $0x10] sm:$0xff]  ;;  %v114_v29 = vld [vmem:[#allocation11 + $0x8] sm:$0xff] }
  0x40   :  { %806 = vmatpush3.msra.mxu0 %v124_v9  ;;  %840 = vmatprep.subr.mxu1 %v226_v10  ;;  %v216_v30 = vld [vmem:[#allocation12 + $0x8] sm:$0xff]  ;;  %v113_v31 = vld [vmem:[#allocation11] sm:$0xff]  ;;  %v112_v33 = vld [vmem:[#allocation6] sm:$0xff] }
  0x41   :  { %807 = vmatprep.subr.mxu0 %v1028_v0  ;;  %841 = vmatpush3.msra.mxu1 %v226_v10  ;;  %v215_v32 = vld [vmem:[#allocation12] sm:$0xff]  ;;  %v1102_v35 = vld [vmem:[#allocation9 + $0x8] sm:$0xff]  ;;  %v1104_v36 = vld [vmem:[#allocation9 + $0x10] sm:$0xff] }
  0x42   :  { %808 = vmatpush3.msra.mxu0 %v123_v11  ;;  %842 = vmatprep.subr.mxu1 %v225_v12  ;;  %v1100_v34 = vld [vmem:[#allocation9] sm:$0xff]  ;;  %v1111_v37 = vld [vmem:[#allocation9 + $0x18] sm:$0xff]  ;;  %v1120_v39 = vld [vmem:[#allocation9 + $0x28] sm:$0xff] }
  0x43   :  { %809 = vmatprep.subr.mxu0 %v1028_v0  ;;  %843 = vmatpush3.msra.mxu1 %v225_v12  ;;  %v1115_v38 = vld [vmem:[#allocation9 + $0x20] sm:$0xff]  ;;  %v1122_v40 = vld [vmem:[#allocation9 + $0x30] sm:$0xff]  ;;  %v1126_v41 = vld [vmem:[#allocation9 + $0x38] sm:$0xff] }
  0x44   :  { %810 = vmatpush3.msra.mxu0 %v122_v13  ;;  %844 = vmatprep.subr.mxu1 %v224_v14  ;;  %v748_v42 = vld [vmem:[%s1188_s4] ss:$0 sm:$0xff] }
  0x45   :  { %811 = vmatprep.subr.mxu0 %v1028_v0  ;;  %845 = vmatpush3.msra.mxu1 %v224_v14  ;;  %v749_v61 = vld [vmem:[%s1189_s5] ss:$0 sm:$0xff] }
  0x46   :  { %812 = vmatpush3.msra.mxu0 %v121_v15  ;;  %846 = vmatprep.subr.mxu1 %v223_v16 }
  0x47   :  { %813 = vmatprep.subr.mxu0 %v1028_v0  ;;  %847 = vmatpush3.msra.mxu1 %v223_v16  ;;  %v1030_v16 = vmov -inf  }
  0x48   :  { %814 = vmatpush3.msra.mxu0 %v120_v17  ;;  %848 = vmatprep.subr.mxu1 %v222_v18  ;;  %109 = vst.msk [vmem:[#allocation3] sm:$0x1] %vm108_vm1, %v1030_v16  ;;  %v385_v17 = vlaneseq }
  0x49   :  { %815 = vmatprep.subr.mxu0 %v1028_v0  ;;  %849 = vmatpush3.msra.mxu1 %v222_v18 }
  0x4a   :  { %816 = vmatpush3.msra.mxu0 %v119_v19  ;;  %850 = vmatprep.subr.mxu1 %v221_v20  ;;  %v1138_v18 = vand.u32 127, %v385_v17  ;;  %v1140_v19 = vshrl.u32 %v385_v17, 7 }
  0x4b   :  { %817 = vmatprep.subr.mxu0 %v1028_v0  ;;  %851 = vmatpush3.msra.mxu1 %v221_v20 }
  0x4c   :  { %818 = vmatpush3.msra.mxu0 %v118_v21  ;;  %852 = vmatprep.subr.mxu1 %v220_v22  ;;  %v400_v21 = vsub.s32 %v1138_v18, %v1140_v19  ;;  %vm389_vm9 = vcmp.lt.s32.totalorder %v1138_v18, 2  ;;  %vm558_vm11 = vcmp.eq.s32.totalorder %v1140_v19, %v1138_v18  ;;  %vm555_vm12 = vcmp.lt.s32.totalorder %v1140_v19, 2 }
  0x4d   :  { %819 = vmatprep.subr.mxu0 %v1028_v0  ;;  %853 = vmatpush3.msra.mxu1 %v220_v22 }
  0x4e   :  { %820 = vmatpush3.msra.mxu0 %v117_v23  ;;  %854 = vmatprep.subr.mxu1 %v219_v24 }
  0x4f   :  { %821 = vmatprep.subr.mxu0 %v1028_v0  ;;  %855 = vmatpush3.msra.mxu1 %v219_v24 }
  0x50   :  { %822 = vmatpush3.msra.mxu0 %v116_v25  ;;  %856 = vmatprep.subr.mxu1 %v218_v26 }
  0x51   :  { %823 = vmatprep.subr.mxu0 %v1028_v0  ;;  %857 = vmatpush3.msra.mxu1 %v218_v26 }
  0x52   :  { %824 = vmatpush3.msra.mxu0 %v115_v27  ;;  %858 = vmatprep.subr.mxu1 %v217_v28 }
  0x53   :  { %825 = vmatprep.subr.mxu0 %v1028_v0  ;;  %859 = vmatpush3.msra.mxu1 %v217_v28 }
  0x54   :  { %826 = vmatpush3.msra.mxu0 %v114_v29  ;;  %860 = vmatprep.subr.mxu1 %v216_v30 }
  0x55   :  { %827 = vmatprep.subr.mxu0 %v1028_v0  ;;  %861 = vmatpush3.msra.mxu1 %v216_v30 }
  0x56   :  { %828 = vmatpush3.msra.mxu0 %v113_v31  ;;  %862 = vmatprep.subr.mxu1 %v215_v32 }
  0x57   :  { %830 = vmatmul.mubr.f32.vlgmr.msra.gmra.mxu0 %v112_v33  ;;  %863 = vmatpush3.msra.mxu1 %v215_v32 }
  0x58   :  { %864 = vmatprep.mubr.f32.mxu1 %v1100_v34  ;;  %876 = vmatprep.subr.mxu0 %v1028_v0 }
  0x59   :  { %865 = vmatmul.mubr.f32.vlgmr.msra.gmra.mxu1 %v1102_v35  ;;  %877 = vmatpush3.msra.mxu0 %v1028_v0 }
  0x5a   :  { %867 = vmatprep.mubr.f32.mxu1 %v1104_v36  ;;  %878 = vmatprep.mubr.msk.f32.mxu0 %vm1029_vm0, %v1028_v0 }
  0x5b   :  { %881 = vmatprep.subr.mxu0 %v1028_v0 }
  0x5d   :  { %868 = vmatmul.mubr.f32.gmra.mxu1 %v1111_v37 }
  0x5e   :  { %870 = vmatprep.mubr.f32.mxu1 %v1115_v38 }
  0x61   :  { %871 = vmatmul.mubr.f32.gmra.mxu1 %v1120_v39 }
  0x62   :  { %873 = vmatprep.mubr.f32.mxu1 %v1122_v40 }
  0x65   :  { %874 = vmatmul.mubr.f32.gmra.mxu1 %v1126_v41 }
 0x117   :  { %v202_v43 = vpop.f32.mrf.mxu0 }
 0x118   :  { %v203_v44 = vadd.f32 %v748_v42, %v202_v43 }
 0x119   :  { %v866_v45 = vpop.f32.mrf.mxu1  ;;  %v831_v46 = vpop.f32.mrf.mxu0 }
 0x11a   :  { %v338_v47 = vadd.f32 %v866_v45, %v203_v44 }
 0x11b   :  { %v297_v48 = vpop.f32.mrf.mxu1 }
 0x11c   :  { %904 = vtanh.f32 %v338_v47  ;;  %v337_v49 = vadd.f32 %v297_v48, %v203_v44 }
 0x11d   :  { %v869_v50 = vpop.f32.mrf.mxu1 }
 0x11e   :  { %906 = vtanh.f32 %v337_v49  ;;  %v340_v51 = vadd.f32 %v869_v50, %v203_v44 }
 0x11f   :  { %v307_v52 = vpop.f32.mrf.mxu1 }
 0x120   :  { %908 = vtanh.f32 %v340_v51  ;;  %v339_v53 = vadd.f32 %v307_v52, %v203_v44 }
 0x121   :  { %v872_v54 = vpop.f32.mrf.mxu1 }
 0x122   :  { %910 = vtanh.f32 %v339_v53  ;;  %v342_v55 = vadd.f32 %v872_v54, %v203_v44 }
 0x123   :  { %v317_v56 = vpop.f32.mrf.mxu1 }
 0x124   :  { %v341_v57 = vadd.f32 %v317_v56, %v203_v44  ;;  %912 = vtanh.f32 %v342_v55 }
 0x125   :  { %v875_v58 = vpop.f32.mrf.mxu1 }
 0x126   :  { %914 = vtanh.f32 %v341_v57  ;;  %v344_v59 = vadd.f32 %v875_v58, %v203_v44 }
 0x127   :  { %v327_v60 = vpop.f32.mrf.mxu1 }
 0x128   :  { %v343_v62 = vadd.f32 %v327_v60, %v203_v44  ;;  %916 = vtanh.f32 %v344_v59  ;;  %v446_v59 = vld [vmem:[#allocation3] sm:$0x1] }
 0x129   :  { %v905_v63 = vpop.eup %904 }
 0x12a   :  { %918 = vtanh.f32 %v343_v62  ;;  %v361_v1 = vmul.f32 %v905_v63, %v749_v61 }
 0x12b   :  { %v907_v2 = vpop.eup %906 }
 0x12c   :  { %370 = vadd.xlane.f32.xlu0 %v361_v1  ;;  %v360_v5 = vmul.f32 %v907_v2, %v749_v61 }
 0x12d   :  { %v909_v3 = vpop.eup %908 }
 0x12e   :  { %v363_v4 = vmul.f32 %v909_v3, %v749_v61 }
 0x12f   :  { %v911_v6 = vpop.eup %910 }
 0x130   :  { %374 = vadd.xlane.f32.xlu1 %v363_v4  ;;  %368 = vadd.xlane.f32.xlu0 %v360_v5  ;;  %v362_v8 = vmul.f32 %v911_v6, %v749_v61  ;;  %v490_v5 = vsub.s32 1, %v1140_v19 }
 0x131   :  { %v913_v7 = vpop.eup %912 }
 0x132   :  { %v365_v12 = vmul.f32 %v913_v7, %v749_v61 }
 0x133   :  { %v915_v9 = vpop.eup %914 }
 0x134   :  { %372 = vadd.xlane.f32.xlu1 %v362_v8  ;;  %v364_v10 = vmul.f32 %v915_v9, %v749_v61  ;;  %v497_v9 = vsub.s32 2, %v1140_v19 }
 0x135   :  { %v917_v11 = vpop.eup %916 }
 0x136   :  { %376 = vadd.xlane.f32.xlu0 %v364_v10  ;;  %v367_v15 = vmul.f32 %v917_v11, %v749_v61  ;;  %v511_v10 = vsub.s32 4, %v1140_v19 }
 0x137   :  { %v919_v13 = vpop.eup %918 }
 0x138   :  { %378 = vadd.xlane.f32.xlu1 %v365_v12  ;;  %v366_v14 = vmul.f32 %v919_v13, %v749_v61  ;;  %v462_v61 = vsub.s32 0, %v1140_v19 }
 0x13a   :  { %380 = vadd.xlane.f32.xlu0 %v366_v14 }
 0x13c   :  { %382 = vadd.xlane.f32.xlu1 %v367_v15 }
 0x1b5   :  { %v371_v20 = vpop.xlane.xlu0 %370 }
 0x1b6   :  { %v405_v25 = vrot.slane %v371_v20, %v400_v21 }
 0x1b9   :  { %v375_v22 = vpop.xlane.xlu1 %374  ;;  %v369_v23 = vpop.xlane.xlu0 %368 }
 0x1ba   :  { %v401_v24 = vrot.slane %v369_v23, %v400_v21  ;;  %v413_v28 = vrot.slane %v375_v22, %v400_v21  ;;  %v525_v22 = vsub.s32 6, %v1140_v19 }
 0x1bc   :  { %v431_v29 = vsel %vm430_vm2, %v405_v25, %v401_v24  ;;  %v468_v25 = vld [vmem:[#allocation4] sm:$0x1] }
 0x1bd   :  { %v373_v26 = vpop.xlane.xlu1 %372 }
 0x1be   :  { %v409_v27 = vrot.slane %v373_v26, %v400_v21 }
 0x1bf   :  { %v377_v30 = vpop.xlane.xlu0 %376 }
 0x1c0   :  { %v433_v31 = vsel %vm432_vm3, %v409_v27, %v431_v29  ;;  %v417_v32 = vrot.slane %v377_v30, %v400_v21 }
 0x1c1   :  { %v435_v33 = vsel %vm434_vm4, %v413_v28, %v433_v31  ;;  %v379_v42 = vpop.xlane.xlu1 %378  ;;  %v518_v28 = vsub.s32 5, %v1140_v19 }
 0x1c2   :  { %v437_v43 = vsel %vm436_vm5, %v417_v32, %v435_v33  ;;  %v421_v44 = vrot.slane %v379_v42, %v400_v21  ;;  %v532_v32 = vsub.s32 7, %v1140_v19 }
 0x1c3   :  { %v381_v45 = vpop.xlane.xlu0 %380 }
 0x1c4   :  { %v439_v46 = vsel %vm438_vm6, %v421_v44, %v437_v43  ;;  %v425_v47 = vrot.slane %v381_v45, %v400_v21 }
 0x1c5   :  { %v383_v48 = vpop.xlane.xlu1 %382 }
 0x1c6   :  { %v441_v49 = vsel %vm440_vm7, %v425_v47, %v439_v46  ;;  %v429_v50 = vrot.slane %v383_v48, %v400_v21  ;;  %v504_v21 = vsub.s32 3, %v1140_v19 }
 0x1c8   :  { %v443_v51 = vsel %vm442_vm8, %v429_v50, %v441_v49 }
 0x1c9   :  { %v445_v52 = vsel %vm389_vm9, %v443_v51, 0.0 }
 0x1ca   :  { %v448_v53 = vsel %vm447_vm10, %v445_v52, -inf }
 0x1cb   :  { %v449_v54 = vrot.slane %v448_v53, 4 }
 0x1cd   :  { %v450_v55 = vmax.f32 %v448_v53, %v449_v54 }
 0x1cf   :  { %v451_v56 = vrot.slane %v450_v55, 2 }
 0x1d1   :  { %v452_v57 = vmax.f32 %v450_v55, %v451_v56 }
 0x1d3   :  { %v453_v58 = vrot.slane %v452_v57, 1 }
 0x1d5   :  { %v454_v60 = vmax.f32 %v452_v57, %v453_v58 }
 0x1d7   :  { %v455_v62 = vmax.f32 %v446_v59, %v454_v60 }
 0x1d9   :  { %v456_v63 = vsub.f32 %v446_v59, %v455_v62  ;;  %v463_v1 = vrot.slane %v455_v62, %v462_v61  ;;  %480 = vst.msk [vmem:[#allocation3] sm:$0x1] %vm108_vm1, %v455_v62 }
 0x1db   :  { %v457_v2 = vmul.f32 1.442695, %v456_v63  ;;  %v465_v3 = vsub.f32 %v445_v52, %v463_v1 }
 0x1dd   :  { %920 = vpow2.f32 %v457_v2  ;;  %v466_v4 = vmul.f32 1.442695, %v465_v3 }
 0x1df   :  { %922 = vpow2.f32 %v466_v4 }
 0x1ea   :  { %v921_v6 = vpop.eup %920 }
 0x1eb   :  { %v563_v7 = vrot.slane %v921_v6, %v462_v61  ;;  %v469_v30 = vmul.f32 %v921_v6, %v468_v25 }
 0x1ec   :  { %v923_v8 = vpop.eup %922 }
 0x1ed   :  { %v470_v11 = vsel %vm447_vm10, %v923_v8, 0.0  ;;  %v565_v12 = vsel %vm558_vm11, %v563_v7, 0.0  ;;  %v491_v13 = vrot.slane %v923_v8, %v490_v5  ;;  %v484_v14 = vrot.slane %v923_v8, %v462_v61 }
 0x1ee   :  { %v471_v15 = vrot.slane %v470_v11, 4  ;;  %879 = vmatmul.mubr.msk.f32.vlgmr.msra.gmra.mxu0 %vm447_vm10, %v565_v12  ;;  %v498_v17 = vrot.slane %v923_v8, %v497_v9  ;;  %v512_v20 = vrot.slane %v923_v8, %v511_v10  ;;  %v505_v26 = vrot.slane %v923_v8, %v504_v21 }
 0x1ef   :  { %493 = vbcast.lane.b32.xlu1 %v491_v13, 256  ;;  %486 = vbcast.lane.b32.xlu0 %v484_v14, 256  ;;  %v526_v27 = vrot.slane %v923_v8, %v525_v22  ;;  %v519_v31 = vrot.slane %v923_v8, %v518_v28  ;;  %v533_v42 = vrot.slane %v923_v8, %v532_v32 }
 0x1f0   :  { %v472_v16 = vadd.f32 %v471_v15, %v470_v11  ;;  %883 = vmatprep.mubr.msk.f32.mxu0 %vm1029_vm0, %v1028_v0 }
 0x1f2   :  { %v473_v23 = vrot.slane %v472_v16, 2 }
 0x1f3   :  { %500 = vbcast.lane.b32.xlu1 %v498_v17, 256  ;;  %514 = vbcast.lane.b32.xlu0 %v512_v20, 256 }
 0x1f4   :  { %v474_v24 = vadd.f32 %v473_v23, %v472_v16 }
 0x1f6   :  { %v475_v29 = vrot.slane %v474_v24, 1 }
 0x1f7   :  { %507 = vbcast.lane.b32.xlu1 %v505_v26, 256  ;;  %528 = vbcast.lane.b32.xlu0 %v526_v27, 256 }
 0x1f8   :  { %v476_v0 = vadd.f32 %v475_v29, %v474_v24 }
 0x1fa   :  { %v477_v33 = vadd.f32 %v476_v0, %v469_v30 }
 0x1fb   :  { %521 = vbcast.lane.b32.xlu1 %v519_v31, 256 }
 0x1fc   :  { %479 = vst.msk [vmem:[#allocation4] sm:$0x1] %vm108_vm1, %v477_v33 }
 0x1ff   :  { %535 = vbcast.lane.b32.xlu1 %v533_v42, 256 }
 0x203   :  { %v643_v43 = vld [vmem:[#allocation4] sm:$0x1] }
 0x204   :  { %924 = vrcp.f32 %v643_v43 }
 0x211   :  { %v925_v44 = vpop.eup %924 }
 0x212   :  { %v650_v45 = vrot.slane %v925_v44, %v462_v61 }
 0x214   :  { %v652_v46 = vsel %vm558_vm11, %v650_v45, 0.0 }
 0x261   :  { %v494_v47 = vpop.permute.xlu1 %493  ;;  %v487_v49 = vpop.permute.xlu0 %486 }
 0x262   :  { %v538_v50 = vmul.f32 %v494_v47, %v1102_v35  ;;  %v537_v51 = vmul.f32 %v487_v49, %v1100_v34 }
 0x264   :  { %v545_v54 = vadd.f32 %v538_v50, %v537_v51 }
 0x265   :  { %v501_v48 = vpop.permute.xlu1 %500  ;;  %v515_v57 = vpop.permute.xlu0 %514 }
 0x266   :  { %v539_v53 = vmul.f32 %v501_v48, %v1104_v36  ;;  %v541_v18 = vmul.f32 %v515_v57, %v1115_v38 }
 0x268   :  { %v546_v56 = vadd.f32 %v545_v54, %v539_v53 }
 0x269   :  { %v508_v52 = vpop.permute.xlu1 %507  ;;  %v529_v62 = vpop.permute.xlu0 %528 }
 0x26a   :  { %v540_v55 = vmul.f32 %v508_v52, %v1111_v37  ;;  %v543_v34 = vmul.f32 %v529_v62, %v1122_v40 }
 0x26c   :  { %v547_v58 = vadd.f32 %v546_v56, %v540_v55 }
 0x26d   :  { %v522_v59 = vpop.permute.xlu1 %521 }
 0x26e   :  { %v542_v60 = vmul.f32 %v522_v59, %v1120_v39  ;;  %v548_v61 = vadd.f32 %v547_v58, %v541_v18 }
 0x270   :  { %v549_v63 = vadd.f32 %v548_v61, %v542_v60 }
 0x271   :  { %v536_v35 = vpop.permute.xlu1 %535 }
 0x272   :  { %v544_v1 = vmul.f32 %v536_v35, %v1126_v41  ;;  %v550_v36 = vadd.f32 %v549_v63, %v543_v34 }
 0x274   :  { %v551_v2 = vadd.f32 %v550_v36, %v544_v1 }
 0x276   :  { %v556_v37 = vsel %vm555_vm12, %v551_v2, 0.0 }
 0x2ae   :  { %v635_v3 = vpop.f32.mrf.mxu0 }
 0x2af   :  { %v636_v4 = vadd.f32 %v635_v3, %v556_v37 }
 0x2b0   :  { %v880_v5 = vpop.f32.mrf.mxu0 }
 0x2b1   :  { %882 = vmatpush3.msra.mxu0 %v636_v4 }
 0x2b2   :  { %884 = vmatmul.mubr.msk.f32.vlgmr.msra.gmra.mxu0 %vm447_vm10, %v652_v46 }
 0x372   :  { %v722_v38 = vpop.f32.mrf.mxu0 }
 0x373   :  { %726 = vst [vmem:[#allocation14] sm:$0xff] %v722_v38 }
 0x374   :  { %v885_v39 = vpop.f32.mrf.mxu0 }
 0x375   :  { %731 = vsyncadd [#allocation8], 96  ;;  %s1031_s5 = smov [#allocation14]  }
 0x376   :  { %s732_s7 = sshll.u32 %s1031_s5, 4  ;;  %s733_s7 = int_to_ptr.vmem [resolvable:$true] %s732_s7 }
 0x377   :  { %s986_s8 = scalar_lea.vmem %s733_s7, 32  ;;  %s990_s9 = scalar_lea.vmem %s733_s7, 128 }
 0x378   :  { %p987_p1 = scmp.ne.s32.totalorder %s733_s7, %s986_s8  ;;  %p991_p2 = scmp.lt.s32.totalorder %s733_s7, %s733_s7 }
 0x379   :  { %p992_p3 = scmp.lt.s32.totalorder %s990_s9, %s986_s8 }
 0x37b   :  { %p993_p4 = por %p992_p3, %p991_p2 }
 0x37d   :  { %p994_p5 = pnand %p993_p4, %p987_p1 }
 0x37f   :  { %997 = shalt.err (!%p994_p5)
}
 0x380   :  { %738 = dma.vmem_to_hbm [thread:$0]  %s733_s7, 32, %s1190_s6, [#allocation8], %s1015_s25, %s1015_s25, %s1016_s26  }
 0x381   :  { %1012 = dma.done.wait [#allocation8], 128  }
 0x382   :  { %1013 = vsyncadd [#allocation8], 4294967168 }
 0x383   :  { %742 = vsyncpa [#allocation7], 1 }
 0x384   :  { %743 = vsyncpa [#allocation10], 1 }
 0x385   :  { %744 = vsyncpa [#allocation13], 1 }
 0x386   :  { %745 = vsyncpa [#allocation8], 1 }

</bundles_post_ra>
